<compile_context>
chip_gen: v7x
topology: tpu7x:2x2x1
jax: 0.10.0
libtpu: 0.0.40
codegen_flags: <defaults>
</compile_context>

<pallas_src>
import functools

import jax
import jax.numpy as jnp
import numpy as np
from jax import lax
from jax.experimental import pallas as pl
from jax.experimental.pallas import tpu as pltpu

LEAKY_SLOPE = 0.01   # nn.LeakyReLU default
BN_EPS = 1e-5        # nn.BatchNorm1d default
HALO = 128           # lane width of the next-tile halo block


def _round_up(a, b):
    return (a + b - 1) // b * b


# ---------------------------------------------------------------------------
# Pass 1: conv (K statically shifted MXU dots) + LeakyReLU + per-(batch,channel) stats.
# ---------------------------------------------------------------------------
def conv_act_stats_kernel(x_ref, xh_ref, w_ref, y_ref, sum_ref, ssq_ref, *,
                          K, stride, l_out, needs_mask):
    # x_ref  : (1, stride, C_in_pad, TL)    current L tile (polyphase input layout)
    # xh_ref : (1, stride, C_in_pad, 128)   first 128 lanes of the next tile (halo)
    # w_ref  : (K, C_in_pad, TC)            lane-dense weights
    # y_ref  : (1, TC, TL)                  pre-BN activations (operand dtype), NCL layout
    # sum_ref/ssq_ref : (1, TC, 1) f32      per-(batch, channel) stats, resident across j
    j_idx = pl.program_id(2)
    TC = w_ref.shape[2]
    TL = y_ref.shape[2]

    @pl.when(j_idx == 0)
    def _init():
        sum_ref[...] = jnp.zeros_like(sum_ref)
        ssq_ref[...] = jnp.zeros_like(ssq_ref)

    # Current tile + 128-lane halo of the next tile; every slice below is static.
    xcat = jnp.concatenate([x_ref[0], xh_ref[0]], axis=-1)     # (stride, C_in_pad, TL + 128)

    acc = jnp.zeros((TC, TL), jnp.float32)
    for k in range(K):                                         # static unroll (K is small)
        r, q = k % stride, k // stride
        xk = xcat[r, :, q:q + TL]                              # (C_in_pad, TL)
        acc = acc + lax.dot_general(
            w_ref[k], xk, (((0,), (0,)), ((), ())),            # contract C_in (sublane axis)
            preferred_element_type=jnp.float32)                # -> (TC, TL)

    y = jnp.maximum(acc, LEAKY_SLOPE * acc)                    # LeakyReLU, f32
    y_ref[0] = y.astype(y_ref.dtype)

    def _accum(yv):
        sum_ref[0] += jnp.sum(yv, axis=-1, keepdims=True)
        ssq_ref[0] += jnp.sum(yv * yv, axis=-1, keepdims=True)

    if needs_mask:
        is_last = j_idx == pl.num_programs(2) - 1

        @pl.when(jnp.logical_not(is_last))
        def _interior():
            _accum(y)

        @pl.when(is_last)
        def _last():
            # Lanes >= L_out are alignment padding; keep them out of the batch statistics.
            lane = lax.broadcasted_iota(jnp.int32, (TC, TL), 1)
            _accum(jnp.where(j_idx * TL + lane < l_out, y, 0.0))
    else:
        _accum(y)


# ---------------------------------------------------------------------------
# Pass 2: fused BatchNorm affine: out = y * scale + shift  (per-channel scale/shift).
# ---------------------------------------------------------------------------
def bn_apply_kernel(y_ref, scale_ref, shift_ref, out_ref):
    out_ref[...] = y_ref[...].astype(jnp.float32) * scale_ref[...] + shift_ref[...]


@functools.partial(jax.jit,
                   static_argnames=("stride", "padding", "lane_tile", "operand_dtype"))
def cnn_block_forward(x, weight, gamma, beta, *, stride, padding,
                      lane_tile=512, operand_dtype=jnp.bfloat16):
    """CNNBlock forward.  x: (N, C_in, L) f32; weight: (C_out, C_in, K); gamma/beta: (C_out,).
    Returns (N, C_out, L_out) f32 (training-mode BatchNorm, biased variance)."""
    # TODO(synk): grouped convolution (groups > 1) and BN running-stat updates not implemented.
    N, C_in, L = x.shape
    C_out, _, K = weight.shape
    L_out = (L + 2 * padding - K) // stride + 1

    # --- static tiling -------------------------------------------------------
    C_in_pad = _round_up(C_in, 16)                    # 16-row sublane packing for bf16
    if C_out <= 128:
        C_out_pad = _round_up(C_out, 8)
        TC = C_out_pad
    elif C_out <= 256:
        C_out_pad = _round_up(C_out, 128)
        TC = C_out_pad                                # up to 256: matches v6e/v7x MXU width
    else:
        C_out_pad = _round_up(C_out, 256)
        TC = 256
    G_c = C_out_pad // TC

    # Lane tile: multiple of 128 (dense, unmasked stores).
    TL = _round_up(min(lane_tile, _round_up(L_out, 128)), 128)
    L_out_pad = _round_up(L_out, TL)
    G_l = L_out_pad // TL
    q_max = (K - 1) // stride
    assert q_max <= HALO, "kernel taps exceed the 128-lane halo"
    L_ph_alloc = (G_l + 1) * TL            # +1 tile so the 128-lane halo block always exists
    needs_mask = (L_out != L_out_pad)

    # --- glue: pad + polyphase split of the input (O(input) bytes; no im2col, no transpose) ---
    x_pad = jnp.pad(x, ((0, 0), (0, 0), (padding, padding)))
    L_valid = (L_out - 1) * stride + K                     # receptive extent actually used
    x_t = x_pad[:, :, :L_valid]
    x_t = jnp.pad(x_t, ((0, 0), (0, C_in_pad - C_in),
                        (0, stride * L_ph_alloc - L_valid)))
    # x_ph[n, r, ci, p] = x_t[n, ci, p*stride + r]
    x_ph = x_t.reshape(N, C_in_pad, L_ph_alloc, stride)
    x_ph = jnp.transpose(x_ph, (0, 3, 1, 2)).astype(operand_dtype)  # (N, stride, C_in_pad, Lp)

    # Lane-dense weights: (K, C_in_pad, C_out_pad), C_out on the lane axis.
    w = jnp.transpose(weight, (2, 1, 0))
    w = jnp.pad(w, ((0, 0), (0, C_in_pad - C_in),
                    (0, C_out_pad - C_out))).astype(operand_dtype)

    # --- pass 1: conv + LeakyReLU + per-(batch,channel) sum / sum-of-squares ---------
    kernel1 = functools.partial(conv_act_stats_kernel, K=K, stride=stride,
                                l_out=L_out, needs_mask=needs_mask)
    y, s_nb, ssq_nb = pl.pallas_call(
        kernel1,
        out_shape=(
            jax.ShapeDtypeStruct((N, C_out_pad, L_out_pad), operand_dtype),
            jax.ShapeDtypeStruct((N, C_out_pad, 1), jnp.float32),
            jax.ShapeDtypeStruct((N, C_out_pad, 1), jnp.float32),
        ),
        grid_spec=pltpu.PrefetchScalarGridSpec(
            num_scalar_prefetch=0,
            grid=(G_c, N, G_l),
            in_specs=[
                pl.BlockSpec((1, stride, C_in_pad, TL), lambda c, n, j: (n, 0, 0, j)),
                # Narrow 128-lane halo of the next tile (L_ph_alloc guarantees it exists).
                pl.BlockSpec((1, stride, C_in_pad, HALO),
                             lambda c, n, j: (n, 0, 0, (j + 1) * (TL // HALO))),
                pl.BlockSpec((K, C_in_pad, TC), lambda c, n, j: (0, 0, c)),
            ],
            out_specs=[
                pl.BlockSpec((1, TC, TL), lambda c, n, j: (n, c, j)),
                pl.BlockSpec((1, TC, 1), lambda c, n, j: (n, c, 0)),
                pl.BlockSpec((1, TC, 1), lambda c, n, j: (n, c, 0)),
            ],
        ),
        compiler_params=pltpu.CompilerParams(
            dimension_semantics=("parallel", "parallel", "arbitrary"),
            vmem_limit_bytes=32 * 1024 * 1024,
        ),
    )(x_ph, x_ph, w)

    # --- tiny per-channel math (O(N*C_out)): fused BN scale / shift ------------
    cnt = jnp.float32(N * L_out)
    s = jnp.sum(s_nb[:, :, 0], axis=0)                       # (C_out_pad,)
    ssq = jnp.sum(ssq_nb[:, :, 0], axis=0)
    mean = s / cnt
    # NOTE: E[y^2]-E[y]^2 in f32 is cancellation-prone for extreme mean/std ratios.
    var = jnp.maximum(ssq / cnt - mean * mean, 0.0)          # biased variance (training BN)
    inv_std = lax.rsqrt(var + BN_EPS)
    gamma_p = jnp.pad(gamma, (0, C_out_pad - C_out), constant_values=1.0)
    beta_p = jnp.pad(beta, (0, C_out_pad - C_out))
    scale = (gamma_p * inv_std).reshape(C_out_pad, 1)
    shift = (beta_p - mean * gamma_p * inv_std).reshape(C_out_pad, 1)

    # --- pass 2: per-channel affine (pure streaming); pick the largest L block that fits ---
    in_bytes = np.dtype(operand_dtype).itemsize
    TL2 = TL
    for m in range(G_l, 0, -1):
        if G_l % m == 0 and m * TL * TC * (in_bytes + 4) * 2 <= 12 * 1024 * 1024:
            TL2 = m * TL
            break
    G_l2 = L_out_pad // TL2

    out = pl.pallas_call(
        bn_apply_kernel,
        out_shape=jax.ShapeDtypeStruct((N, C_out_pad, L_out_pad), jnp.float32),
        grid_spec=pltpu.PrefetchScalarGridSpec(
            num_scalar_prefetch=0,
            grid=(G_c, N, G_l2),
            in_specs=[
                pl.BlockSpec((1, TC, TL2), lambda c, n, j: (n, c, j)),
                pl.BlockSpec((TC, 1), lambda c, n, j: (c, 0)),
                pl.BlockSpec((TC, 1), lambda c, n, j: (c, 0)),
            ],
            out_specs=pl.BlockSpec((1, TC, TL2), lambda c, n, j: (n, c, j)),
        ),
        compiler_params=pltpu.CompilerParams(
            dimension_semantics=("parallel", "parallel", "parallel"),
            vmem_limit_bytes=32 * 1024 * 1024,
        ),
    )(y, scale, shift)

    # Trim alignment padding.  Output is already NCL — no transpose.
    return out[:, :C_out, :L_out]


def _reference(x, weight, gamma, beta, *, stride, padding):
    """Pure-JAX reference matching PyTorch semantics (training-mode BN)."""
    y = lax.conv_general_dilated(
        x, weight, window_strides=(stride,), padding=[(padding, padding)],
        dimension_numbers=("NCH", "OIH", "NCH"))
    y = jnp.where(y > 0, y, LEAKY_SLOPE * y)
    mean = jnp.mean(y, axis=(0, 2), keepdims=True)
    var = jnp.mean((y - mean) ** 2, axis=(0, 2), keepdims=True)  # biased
    return gamma[None, :, None] * (y - mean) * lax.rsqrt(var + BN_EPS) + beta[None, :, None]


if __name__ == "__main__":
    # CNNBlock(input_channels=4, out_channels=8, kernel_size=3, stride=1, padding=1)
    # on a (N=2, C=4, L=16) input.
    N, C_in, L = 2, 4, 16
    C_out, K, stride, padding = 8, 3, 1, 1

    key = jax.random.PRNGKey(0)
    kx, kw = jax.random.split(key)
    x = jax.random.normal(kx, (N, C_in, L), dtype=jnp.float32)
    weight = 0.1 * jax.random.normal(kw, (C_out, C_in, K), dtype=jnp.float32)
    gamma = 1.0 + 0.1 * jnp.arange(C_out, dtype=jnp.float32)   # BN affine weight
    beta = 0.05 * jnp.arange(C_out, dtype=jnp.float32)         # BN affine bias

    ref = _reference(x, weight, gamma, beta, stride=stride, padding=padding)

    # Exact-precision path (f32 operands + f32 intermediate): tight check.
    out_f32 = cnn_block_forward(x, weight, gamma, beta, stride=stride, padding=padding,
                                operand_dtype=jnp.float32)
    out_f32 = jax.block_until_ready(out_f32)
    np.testing.assert_allclose(np.asarray(out_f32), np.asarray(ref), rtol=1e-4, atol=1e-4)

    # Default perf path (bf16 operands + bf16 intermediate, f32 accumulation): loose sanity check.
    out = cnn_block_forward(x, weight, gamma, beta, stride=stride, padding=padding)
    out = jax.block_until_ready(out)
    np.testing.assert_allclose(np.asarray(out), np.asarray(ref), rtol=5e-2, atol=1e-1)

    # Strided config exercises the polyphase / halo path:
    # CNNBlock(4, 16, kernel_size=4, stride=2, padding=1) on (N=2, C=4, L=32).
    k2x, k2w = jax.random.split(jax.random.PRNGKey(1))
    x2 = jax.random.normal(k2x, (2, 4, 32), dtype=jnp.float32)
    w2 = 0.1 * jax.random.normal(k2w, (16, 4, 4), dtype=jnp.float32)
    g2 = jnp.ones((16,), jnp.float32)
    b2 = jnp.zeros((16,), jnp.float32)
    ref2 = _reference(x2, w2, g2, b2, stride=2, padding=1)
    out2 = cnn_block_forward(x2, w2, g2, b2, stride=2, padding=1,
                             operand_dtype=jnp.float32)
    out2 = jax.block_until_ready(out2)
    np.testing.assert_allclose(np.asarray(out2), np.asarray(ref2), rtol=1e-4, atol=1e-4)

    print("KERNEL_OK")
</pallas_src>

<mosaic_0001>
module attributes {stable_mosaic.version = 11 : i64} {
  func.func @conv_act_stats_kernel(%arg0: i32, %arg1: i32, %arg2: i32, %arg3: memref<1x1x16x128xf32, #tpu.memory_space<vmem>>, %arg4: memref<1x1x16x128xf32, #tpu.memory_space<vmem>>, %arg5: memref<3x16x8xf32, #tpu.memory_space<vmem>>, %arg6: memref<1x8x128xf32, #tpu.memory_space<vmem>>, %arg7: memref<1x8x1xf32, #tpu.memory_space<vmem>>, %arg8: memref<1x8x1xf32, #tpu.memory_space<vmem>>) attributes {dimension_semantics = [#tpu.dimension_semantics<parallel>, #tpu.dimension_semantics<parallel>, #tpu.dimension_semantics<arbitrary>], iteration_bounds = array<i64: 1, 2, 1>, scalar_prefetch = 0 : i64, scratch_operands = 0 : i64, tpu.core_type = #tpu.core_type<tc>, window_params = [{transform_indices = @transform_0, window_bounds = array<i64: 1, 1, 16, 128>}, {transform_indices = @transform_1, window_bounds = array<i64: 1, 1, 16, 128>}, {transform_indices = @transform_2, window_bounds = array<i64: 3, 16, 8>}, {transform_indices = @transform_3, window_bounds = array<i64: 1, 8, 128>}, {transform_indices = @transform_4, window_bounds = array<i64: 1, 8, 1>}, {transform_indices = @transform_5, window_bounds = array<i64: 1, 8, 1>}]} {
    %c0_i32 = arith.constant 0 : i32
    %0 = arith.cmpi eq, %arg2, %c0_i32 : i32
    %1 = arith.extui %0 : i1 to i32
    %c0_i32_0 = arith.constant 0 : i32
    %2 = arith.cmpi ne, %1, %c0_i32_0 : i32
    scf.if %2 {
      %cst_25 = arith.constant 0.000000e+00 : f32
      %39 = vector.broadcast %cst_25 : f32 to vector<1x8x1xf32>
      %c0_26 = arith.constant 0 : index
      %c0_27 = arith.constant 0 : index
      %c0_28 = arith.constant 0 : index
      %40 = vector.load %arg7[%c0_26, %c0_27, %c0_28] : memref<1x8x1xf32, #tpu.memory_space<vmem>>, vector<1x8x1xf32>
      tpu.vector_store %arg7[%c0_26, %c0_27, %c0_28], %39 {strides = array<i32>} : memref<1x8x1xf32, #tpu.memory_space<vmem>>, vector<1x8x1xf32>,
      %cst_29 = arith.constant 0.000000e+00 : f32
      %41 = vector.broadcast %cst_29 : f32 to vector<1x8x1xf32>
      %c0_30 = arith.constant 0 : index
      %c0_31 = arith.constant 0 : index
      %c0_32 = arith.constant 0 : index
      %42 = vector.load %arg8[%c0_30, %c0_31, %c0_32] : memref<1x8x1xf32, #tpu.memory_space<vmem>>, vector<1x8x1xf32>
      tpu.vector_store %arg8[%c0_30, %c0_31, %c0_32], %41 {strides = array<i32>} : memref<1x8x1xf32, #tpu.memory_space<vmem>>, vector<1x8x1xf32>,
    } else {
    }
    %c0 = arith.constant 0 : index
    %c0_1 = arith.constant 0 : index
    %c0_2 = arith.constant 0 : index
    %c0_3 = arith.constant 0 : index
    %3 = vector.load %arg3[%c0, %c0_1, %c0_2, %c0_3] : memref<1x1x16x128xf32, #tpu.memory_space<vmem>>, vector<1x1x16x128xf32>
    %4 = vector.shape_cast %3 : vector<1x1x16x128xf32> to vector<1x16x128xf32>
    %c0_4 = arith.constant 0 : index
    %c0_5 = arith.constant 0 : index
    %c0_6 = arith.constant 0 : index
    %c0_7 = arith.constant 0 : index
    %5 = vector.load %arg4[%c0_4, %c0_5, %c0_6, %c0_7] : memref<1x1x16x128xf32, #tpu.memory_space<vmem>>, vector<1x1x16x128xf32>
    %6 = vector.shape_cast %5 : vector<1x1x16x128xf32> to vector<1x16x128xf32>
    %7 = tpu.concatenate %4, %6 in 2 : vector<1x16x128xf32>, vector<1x16x128xf32> -> vector<1x16x256xf32>
    %cst = arith.constant 0.000000e+00 : f32
    %8 = vector.broadcast %cst : f32 to vector<8x128xf32>
    %9 = vector.extract_strided_slice %7 {offsets = [0, 0, 0], sizes = [1, 16, 128], strides = [1, 1, 1]} : vector<1x16x256xf32> to vector<1x16x128xf32>
    %10 = vector.shape_cast %9 : vector<1x16x128xf32> to vector<16x128xf32>
    %c0_8 = arith.constant 0 : index
    %c0_9 = arith.constant 0 : index
    %c0_10 = arith.constant 0 : index
    %11 = vector.load %arg5[%c0_8, %c0_9, %c0_10] : memref<3x16x8xf32, #tpu.memory_space<vmem>>, vector<1x16x8xf32>
    %12 = vector.shape_cast %11 : vector<1x16x8xf32> to vector<16x8xf32>
    %cst_11 = arith.constant dense<0.000000e+00> : vector<8x128xf32>
    %13 = tpu.matmul %12, %10, %cst_11 {dimension_numbers = #tpu.dot_dimension_numbers<[0], [0], [1], [1], [0, 1, 1, 1], [], []>} : vector<16x8xf32>, vector<16x128xf32>, vector<8x128xf32> -> vector<8x128xf32>
    %14 = arith.addf %8, %13 : vector<8x128xf32>
    %15 = vector.extract_strided_slice %7 {offsets = [0, 0, 1], sizes = [1, 16, 128], strides = [1, 1, 1]} : vector<1x16x256xf32> to vector<1x16x128xf32>
    %16 = vector.shape_cast %15 : vector<1x16x128xf32> to vector<16x128xf32>
    %c1 = arith.constant 1 : index
    %c0_12 = arith.constant 0 : index
    %c0_13 = arith.constant 0 : index
    %17 = vector.load %arg5[%c1, %c0_12, %c0_13] : memref<3x16x8xf32, #tpu.memory_space<vmem>>, vector<1x16x8xf32>
    %18 = vector.shape_cast %17 : vector<1x16x8xf32> to vector<16x8xf32>
    %cst_14 = arith.constant dense<0.000000e+00> : vector<8x128xf32>
    %19 = tpu.matmul %18, %16, %cst_14 {dimension_numbers = #tpu.dot_dimension_numbers<[0], [0], [1], [1], [0, 1, 1, 1], [], []>} : vector<16x8xf32>, vector<16x128xf32>, vector<8x128xf32> -> vector<8x128xf32>
    %20 = arith.addf %14, %19 : vector<8x128xf32>
    %21 = vector.extract_strided_slice %7 {offsets = [0, 0, 2], sizes = [1, 16, 128], strides = [1, 1, 1]} : vector<1x16x256xf32> to vector<1x16x128xf32>
    %22 = vector.shape_cast %21 : vector<1x16x128xf32> to vector<16x128xf32>
    %c2 = arith.constant 2 : index
    %c0_15 = arith.constant 0 : index
    %c0_16 = arith.constant 0 : index
    %23 = vector.load %arg5[%c2, %c0_15, %c0_16] : memref<3x16x8xf32, #tpu.memory_space<vmem>>, vector<1x16x8xf32>
    %24 = vector.shape_cast %23 : vector<1x16x8xf32> to vector<16x8xf32>
    %cst_17 = arith.constant dense<0.000000e+00> : vector<8x128xf32>
    %25 = tpu.matmul %24, %22, %cst_17 {dimension_numbers = #tpu.dot_dimension_numbers<[0], [0], [1], [1], [0, 1, 1, 1], [], []>} : vector<16x8xf32>, vector<16x128xf32>, vector<8x128xf32> -> vector<8x128xf32>
    %26 = arith.addf %20, %25 : vector<8x128xf32>
    %cst_18 = arith.constant 0.00999999977 : f32
    %27 = vector.broadcast %cst_18 : f32 to vector<8x128xf32>
    %28 = arith.mulf %27, %26 : vector<8x128xf32>
    %29 = arith.maximumf %26, %28 : vector<8x128xf32>
    %c0_19 = arith.constant 0 : index
    %c0_20 = arith.constant 0 : index
    %c0_21 = arith.constant 0 : index
    %30 = vector.load %arg6[%c0_19, %c0_20, %c0_21] : memref<1x8x128xf32, #tpu.memory_space<vmem>>, vector<1x8x128xf32>
    %31 = vector.shape_cast %30 : vector<1x8x128xf32> to vector<8x128xf32>
    %32 = vector.shape_cast %29 : vector<8x128xf32> to vector<1x8x128xf32>
    tpu.vector_store %arg6[%c0_19, %c0_20, %c0_21], %32 {strides = array<i32>} : memref<1x8x128xf32, #tpu.memory_space<vmem>>, vector<1x8x128xf32>,
    %c0_i32_22 = arith.constant 0 : i32
    %33 = arith.cmpi eq, %arg2, %c0_i32_22 : i32
    %true = arith.constant true
    %34 = arith.xori %33, %true : i1
    %35 = arith.extui %34 : i1 to i32
    %c0_i32_23 = arith.constant 0 : i32
    %36 = arith.cmpi ne, %35, %c0_i32_23 : i32
    scf.if %36 {
      %c0_25 = arith.constant 0 : index
      %c0_26 = arith.constant 0 : index
      %c0_27 = arith.constant 0 : index
      %39 = vector.load %arg7[%c0_25, %c0_26, %c0_27] : memref<1x8x1xf32, #tpu.memory_space<vmem>>, vector<1x8x1xf32>
      %40 = vector.shape_cast %39 : vector<1x8x1xf32> to vector<8x1xf32>
      %cst_28 = arith.constant dense<0.000000e+00> : vector<8xf32>
      %41 = vector.multi_reduction <add>, %29, %cst_28 [1] : vector<8x128xf32> to vector<8xf32>
      %42 = vector.shape_cast %41 : vector<8xf32> to vector<8x1xf32>
      %43 = arith.addf %40, %42 : vector<8x1xf32>
      %c0_29 = arith.constant 0 : index
      %c0_30 = arith.constant 0 : index
      %c0_31 = arith.constant 0 : index
      %44 = vector.load %arg7[%c0_29, %c0_30, %c0_31] : memref<1x8x1xf32, #tpu.memory_space<vmem>>, vector<1x8x1xf32>
      %45 = vector.shape_cast %44 : vector<1x8x1xf32> to vector<8x1xf32>
      %46 = vector.shape_cast %43 : vector<8x1xf32> to vector<1x8x1xf32>
      tpu.vector_store %arg7[%c0_29, %c0_30, %c0_31], %46 {strides = array<i32>} : memref<1x8x1xf32, #tpu.memory_space<vmem>>, vector<1x8x1xf32>,
      %c0_32 = arith.constant 0 : index
      %c0_33 = arith.constant 0 : index
      %c0_34 = arith.constant 0 : index
      %47 = vector.load %arg8[%c0_32, %c0_33, %c0_34] : memref<1x8x1xf32, #tpu.memory_space<vmem>>, vector<1x8x1xf32>
      %48 = vector.shape_cast %47 : vector<1x8x1xf32> to vector<8x1xf32>
      %49 = arith.mulf %29, %29 : vector<8x128xf32>
      %cst_35 = arith.constant dense<0.000000e+00> : vector<8xf32>
      %50 = vector.multi_reduction <add>, %49, %cst_35 [1] : vector<8x128xf32> to vector<8xf32>
      %51 = vector.shape_cast %50 : vector<8xf32> to vector<8x1xf32>
      %52 = arith.addf %48, %51 : vector<8x1xf32>
      %c0_36 = arith.constant 0 : index
      %c0_37 = arith.constant 0 : index
      %c0_38 = arith.constant 0 : index
      %53 = vector.load %arg8[%c0_36, %c0_37, %c0_38] : memref<1x8x1xf32, #tpu.memory_space<vmem>>, vector<1x8x1xf32>
      %54 = vector.shape_cast %53 : vector<1x8x1xf32> to vector<8x1xf32>
      %55 = vector.shape_cast %52 : vector<8x1xf32> to vector<1x8x1xf32>
      tpu.vector_store %arg8[%c0_36, %c0_37, %c0_38], %55 {strides = array<i32>} : memref<1x8x1xf32, #tpu.memory_space<vmem>>, vector<1x8x1xf32>,
    } else {
    }
    %37 = arith.extui %33 : i1 to i32
    %c0_i32_24 = arith.constant 0 : i32
    %38 = arith.cmpi ne, %37, %c0_i32_24 : i32
    scf.if %38 {
      %39 = tpu.iota {dimensions = array<i32: 1>} : vector<8x128xi32>
      %c128_i32 = arith.constant 128 : i32
      %40 = arith.muli %arg2, %c128_i32 : i32
      %41 = vector.broadcast %40 : i32 to vector<8x128xi32>
      %42 = arith.addi %41, %39 : vector<8x128xi32>
      %c16_i32 = arith.constant 16 : i32
      %43 = vector.broadcast %c16_i32 : i32 to vector<8x128xi32>
      %44 = arith.cmpi slt, %42, %43 : vector<8x128xi32>
      %cst_25 = arith.constant 0.000000e+00 : f32
      %45 = vector.broadcast %cst_25 : f32 to vector<8x128xf32>
      %46 = arith.select %44, %29, %45 : vector<8x128xi1>, vector<8x128xf32>
      %c0_26 = arith.constant 0 : index
      %c0_27 = arith.constant 0 : index
      %c0_28 = arith.constant 0 : index
      %47 = vector.load %arg7[%c0_26, %c0_27, %c0_28] : memref<1x8x1xf32, #tpu.memory_space<vmem>>, vector<1x8x1xf32>
      %48 = vector.shape_cast %47 : vector<1x8x1xf32> to vector<8x1xf32>
      %cst_29 = arith.constant dense<0.000000e+00> : vector<8xf32>
      %49 = vector.multi_reduction <add>, %46, %cst_29 [1] : vector<8x128xf32> to vector<8xf32>
      %50 = vector.shape_cast %49 : vector<8xf32> to vector<8x1xf32>
      %51 = arith.addf %48, %50 : vector<8x1xf32>
      %c0_30 = arith.constant 0 : index
      %c0_31 = arith.constant 0 : index
      %c0_32 = arith.constant 0 : index
      %52 = vector.load %arg7[%c0_30, %c0_31, %c0_32] : memref<1x8x1xf32, #tpu.memory_space<vmem>>, vector<1x8x1xf32>
      %53 = vector.shape_cast %52 : vector<1x8x1xf32> to vector<8x1xf32>
      %54 = vector.shape_cast %51 : vector<8x1xf32> to vector<1x8x1xf32>
      tpu.vector_store %arg7[%c0_30, %c0_31, %c0_32], %54 {strides = array<i32>} : memref<1x8x1xf32, #tpu.memory_space<vmem>>, vector<1x8x1xf32>,
      %c0_33 = arith.constant 0 : index
      %c0_34 = arith.constant 0 : index
      %c0_35 = arith.constant 0 : index
      %55 = vector.load %arg8[%c0_33, %c0_34, %c0_35] : memref<1x8x1xf32, #tpu.memory_space<vmem>>, vector<1x8x1xf32>
      %56 = vector.shape_cast %55 : vector<1x8x1xf32> to vector<8x1xf32>
      %57 = arith.mulf %46, %46 : vector<8x128xf32>
      %cst_36 = arith.constant dense<0.000000e+00> : vector<8xf32>
      %58 = vector.multi_reduction <add>, %57, %cst_36 [1] : vector<8x128xf32> to vector<8xf32>
      %59 = vector.shape_cast %58 : vector<8xf32> to vector<8x1xf32>
      %60 = arith.addf %56, %59 : vector<8x1xf32>
      %c0_37 = arith.constant 0 : index
      %c0_38 = arith.constant 0 : index
      %c0_39 = arith.constant 0 : index
      %61 = vector.load %arg8[%c0_37, %c0_38, %c0_39] : memref<1x8x1xf32, #tpu.memory_space<vmem>>, vector<1x8x1xf32>
      %62 = vector.shape_cast %61 : vector<1x8x1xf32> to vector<8x1xf32>
      %63 = vector.shape_cast %60 : vector<8x1xf32> to vector<1x8x1xf32>
      tpu.vector_store %arg8[%c0_37, %c0_38, %c0_39], %63 {strides = array<i32>} : memref<1x8x1xf32, #tpu.memory_space<vmem>>, vector<1x8x1xf32>,
    } else {
    }
    return
  }
  func.func @transform_0(%arg0: i32, %arg1: i32, %arg2: i32) -> (i32, i32, i32, i32) {
    %c0_i32 = arith.constant 0 : i32
    %c0_i32_0 = arith.constant 0 : i32
    %c0_i32_1 = arith.constant 0 : i32
    return %arg1, %c0_i32, %c0_i32_0, %arg2 : i32, i32, i32, i32
  }
  func.func @transform_1(%arg0: i32, %arg1: i32, %arg2: i32) -> (i32, i32, i32, i32) {
    %c1_i32 = arith.constant 1 : i32
    %0 = arith.addi %arg2, %c1_i32 : i32
    %c1_i32_0 = arith.constant 1 : i32
    %1 = arith.muli %0, %c1_i32_0 : i32
    %c0_i32 = arith.constant 0 : i32
    %c0_i32_1 = arith.constant 0 : i32
    %c0_i32_2 = arith.constant 0 : i32
    return %arg1, %c0_i32, %c0_i32_1, %1 : i32, i32, i32, i32
  }
  func.func @transform_2(%arg0: i32, %arg1: i32, %arg2: i32) -> (i32, i32, i32) {
    %c0_i32 = arith.constant 0 : i32
    %c0_i32_0 = arith.constant 0 : i32
    %c0_i32_1 = arith.constant 0 : i32
    return %c0_i32, %c0_i32_0, %arg0 : i32, i32, i32
  }
  func.func @transform_3(%arg0: i32, %arg1: i32, %arg2: i32) -> (i32, i32, i32) {
    %c0_i32 = arith.constant 0 : i32
    return %arg1, %arg0, %arg2 : i32, i32, i32
  }
  func.func @transform_4(%arg0: i32, %arg1: i32, %arg2: i32) -> (i32, i32, i32) {
    %c0_i32 = arith.constant 0 : i32
    %c0_i32_0 = arith.constant 0 : i32
    return %arg1, %arg0, %c0_i32 : i32, i32, i32
  }
  func.func @transform_5(%arg0: i32, %arg1: i32, %arg2: i32) -> (i32, i32, i32) {
    %c0_i32 = arith.constant 0 : i32
    %c0_i32_0 = arith.constant 0 : i32
    return %arg1, %arg0, %c0_i32 : i32, i32, i32
  }
}

module attributes {stable_mosaic.version = 11 : i64} {
  func.func @bn_apply_kernel(%arg0: i32, %arg1: i32, %arg2: i32, %arg3: memref<1x8x128xf32, #tpu.memory_space<vmem>>, %arg4: memref<8x1xf32, #tpu.memory_space<vmem>>, %arg5: memref<8x1xf32, #tpu.memory_space<vmem>>, %arg6: memref<1x8x128xf32, #tpu.memory_space<vmem>>) attributes {dimension_semantics = [#tpu.dimension_semantics<parallel>, #tpu.dimension_semantics<parallel>, #tpu.dimension_semantics<parallel>], iteration_bounds = array<i64: 1, 2, 1>, scalar_prefetch = 0 : i64, scratch_operands = 0 : i64, tpu.core_type = #tpu.core_type<tc>, window_params = [{transform_indices = @transform_0, window_bounds = array<i64: 1, 8, 128>}, {transform_indices = @transform_1, window_bounds = array<i64: 8, 1>}, {transform_indices = @transform_2, window_bounds = array<i64: 8, 1>}, {transform_indices = @transform_3, window_bounds = array<i64: 1, 8, 128>}]} {
    %c0 = arith.constant 0 : index
    %c0_0 = arith.constant 0 : index
    %c0_1 = arith.constant 0 : index
    %0 = vector.load %arg3[%c0, %c0_0, %c0_1] : memref<1x8x128xf32, #tpu.memory_space<vmem>>, vector<1x8x128xf32>
    %c0_2 = arith.constant 0 : index
    %c0_3 = arith.constant 0 : index
    %1 = vector.load %arg4[%c0_2, %c0_3] : memref<8x1xf32, #tpu.memory_space<vmem>>, vector<8x1xf32>
    %2 = vector.shape_cast %1 : vector<8x1xf32> to vector<1x8x1xf32>
    %3 = vector.broadcast %2 : vector<1x8x1xf32> to vector<1x8x128xf32>
    %4 = arith.mulf %0, %3 : vector<1x8x128xf32>
    %c0_4 = arith.constant 0 : index
    %c0_5 = arith.constant 0 : index
    %5 = vector.load %arg5[%c0_4, %c0_5] : memref<8x1xf32, #tpu.memory_space<vmem>>, vector<8x1xf32>
    %6 = vector.shape_cast %5 : vector<8x1xf32> to vector<1x8x1xf32>
    %7 = vector.broadcast %6 : vector<1x8x1xf32> to vector<1x8x128xf32>
    %8 = arith.addf %4, %7 : vector<1x8x128xf32>
    %c0_6 = arith.constant 0 : index
    %c0_7 = arith.constant 0 : index
    %c0_8 = arith.constant 0 : index
    %9 = vector.load %arg6[%c0_6, %c0_7, %c0_8] : memref<1x8x128xf32, #tpu.memory_space<vmem>>, vector<1x8x128xf32>
    tpu.vector_store %arg6[%c0_6, %c0_7, %c0_8], %8 {strides = array<i32>} : memref<1x8x128xf32, #tpu.memory_space<vmem>>, vector<1x8x128xf32>,
    return
  }
  func.func @transform_0(%arg0: i32, %arg1: i32, %arg2: i32) -> (i32, i32, i32) {
    %c0_i32 = arith.constant 0 : i32
    return %arg1, %arg0, %arg2 : i32, i32, i32
  }
  func.func @transform_1(%arg0: i32, %arg1: i32, %arg2: i32) -> (i32, i32) {
    %c0_i32 = arith.constant 0 : i32
    %c0_i32_0 = arith.constant 0 : i32
    return %arg0, %c0_i32 : i32, i32
  }
  func.func @transform_2(%arg0: i32, %arg1: i32, %arg2: i32) -> (i32, i32) {
    %c0_i32 = arith.constant 0 : i32
    %c0_i32_0 = arith.constant 0 : i32
    return %arg0, %c0_i32 : i32, i32
  }
  func.func @transform_3(%arg0: i32, %arg1: i32, %arg2: i32) -> (i32, i32, i32) {
    %c0_i32 = arith.constant 0 : i32
    return %arg1, %arg0, %arg2 : i32, i32, i32
  }
}

</mosaic_0001>

<bundles_post_ra>
// kernel: cnn_block_forward.3
= control target key start
LH: loop header
LB: loop body
LE: loop exit
PB: predicated region body
PF: predicated region fallthrough
CT: control target
= control target key end

     0   :  { %8 = vsyncpa [#allocation3], 0  ;;  %s675_s0 = inlined_call_operand.vmem [shape: f32[2,8,128], index: 0, kind: input, shape index: {}]   ;;  %s676_s1 = inlined_call_operand.vmem [shape: f32[8,1], index: 1, kind: input, shape index: {}]   ;;  %s677_s2 = inlined_call_operand.vmem [shape: f32[8,1], index: 2, kind: input, shape index: {}]   ;;  %s678_s3 = inlined_call_operand.hbm [shape: f32[2,8,128], index: 3, kind: output, shape index: {}]  }
   0x1   :  { %10 = vsyncpa [#allocation3 + $0x1], 0  ;;  %s557_s12 = smov 0   ;;  %s559_s13 = smov 0  }
   0x2   :  { %s561_s14 = smov 0   ;;  %s563_s15 = smov 0  }
   0x3   :  { %s565_s16 = smov 0   ;;  %s567_s17 = smov 0  }
   0x4 LB: > { %s385_s18 = sadd.s32 4294967295, %s533_s17   ;;  %s386_s19 = sadd.s32 4294967294, %s533_s17   ;;  %s533_s17 = sphi %s567_s17, %s16_s17   ;;  %s529_s16 = sphi %s565_s16, %s685_s16   ;;  %s525_s15 = sphi %s563_s15, %s684_s15   ;;  %s521_s14 = sphi %s561_s14, %s683_s14   ;;  %s517_s13 = sphi %s559_s13, %s682_s13   ;;  %s513_s12 = sphi %s557_s12, %s681_s12  }
   0x5   : > { %s31_s20 = sadd.s32 1, %s529_s16  ;;  %s128_s21 = sadd.s32 1, %s521_s14 }
   0x6   : > { %p33_p0 = scmp.ge.s32.totalorder %s31_s20, 2  ;;  %p138_p1 = scmp.ne.s32.totalorder %s521_s14, %s517_s13 }
   0x7   : > { %p139_p2 = scmp.eq.s32.totalorder %s385_s18, 1  ;;  %p144_p3 = scmp.ne.s32.totalorder %s517_s13, %s513_s12 }
   0x8   : > { %s687_s20 = smov (%p33_p0, %s31_s20), 0  ;;  %p145_p5 = scmp.eq.s32.totalorder %s386_s19, 1 }
   0x9   : > { %p597_p4 = por %p139_p2, %p138_p1  ;;  %s121_s23 = ssub.s32 %s529_s16, %s687_s20 }
   0xa   : > { %p391_p6 = scmp.ge.s32.totalorder %s533_s17, 1  ;;  %p126_p7 = scmp.eq.s32.totalorder %s121_s23, 0 }
   0xb   : > { %p604_p8 = por %p145_p5, %p144_p3  ;;  %p190_p9 = scmp.lt.s32.totalorder %s533_s17, 3 }
   0xc   : > { %s610_s25 = scalar_select %p126_p7, %s521_s14, %s128_s21  }
   0xd   : > { %p191_p10 = pnand %p391_p6, %p190_p9 }
   0xe   : > { %v246_v0 = vld [vmem:[%s676_s1] sm:$0xff] (!%p191_p10)  ;;  %v535_v1 = vmov (!%p191_p10), 0   ;;  %p227_p11 = scmp.lt.s32.totalorder (!%p191_p10), %s525_s15, 1  ;;  %s224_s4 = sand.u32 (!%p191_p10), 1, %s517_s13  }
   0xf   : > { %194 = sbr.rel (%p191_p10) target bundleno = 164 (0xa4), region = 32  ;;  %454 = vset.pattern.permute.xlu0 (!%p191_p10), %v535_v1  ;;  %v253_v2 = vld [vmem:[%s677_s2] sm:$0xff] (!%p191_p10)  ;;  %s392_s6 = sshll.u32 (!%p191_p10), %s224_s4, 3 }
  0x10   : > { %249 = vperm.xlu0 (!%p191_p10), %454, %v246_v0   ;;  %s395_s10 = sshll.u32 (!%p191_p10), %s525_s15, 7  ;;  %s226_s11 = scalar_lea.vmem (!%p191_p10), [#allocation2], %s392_s6 }
  0x11   : > { %s277_s18 = sshll.u32 (!%p191_p10), %s226_s11, 4  ;;  %s628_s23 = scalar_lea.hbm (!%p191_p10), %s678_s3, %s395_s10  ;;  %s630_s18 = int_to_ptr.vmem [resolvable:$true] %s277_s18 }
  0x12   : > { %s262_s26 = scalar_lea.sflag (!%p191_p10), [#allocation3], %s224_s4  ;;  %s455_s27 = scalar_lea.vmem (!%p191_p10), %s630_s18, 128 }
  0x13   : > { %p456_p12 = scmp.ne.s32.totalorder (!%p191_p10), %s630_s18, %s455_s27 }
  0x14   : > { %256 = vperm.xlu0 (!%p191_p10), %454, %v253_v2  }
  0x15   : > { %p457_p13 = pnand (!%p191_p10), %p456_p12, %p597_p4 }
  0x16   : > { %s228_s30 = scalar_select %p227_p11, %s525_s15, 1 }
  0x17   : > { %p458_p0 = pneg %p457_p13  ;;  %s536_s15 = smov [#allocation2]  }
  0x18   : > { %s393_s5 = sshll.u32 %s228_s30, 3  ;;  %s459_s28 = sshll.u32 %s536_s15, 4  ;;  %s460_s28 = int_to_ptr.vmem [resolvable:$false] %s459_s28 }
  0x19   : > { %s236_s9 = scalar_lea.vmem %s675_s0, %s393_s5  ;;  %s461_s29 = scalar_lea.vmem %s460_s28, 256 }
  0x1a   : > { %v245_v4 = vld [vmem:[%s236_s9] sm:$0xff]  ;;  %p462_p1 = scmp.lt.s32.totalorder %s630_s18, %s460_s28  ;;  %p463_p2 = scmp.lt.s32.totalorder %s461_s29, %s455_s27 }
  0x1c   : > { %p464_p3 = por %p463_p2, %p462_p1 }
  0x1e   : > { %p465_p5 = pnand %p464_p3, %p458_p0 }
  0x8f   : > { %v250_v3 = vpop.permute.xlu0 %249 }
  0x90   : > { %v252_v5 = vmul.f32 %v250_v3, %v245_v4 }
  0x93   : > { %v257_v6 = vpop.permute.xlu0 %256 }
  0x94   : > { %v259_v7 = vadd.f32 %v257_v6, %v252_v5 }
  0x96   : > { %260 = vst [vmem:[%s226_s11] sm:$0xff] %v259_v7 }
  0x97   : > { %468 = shalt.err (!%p465_p5)
}
  0x98   : > { %s469_s30 = scalar_lea.hbm %s628_s23, 128  ;;  %s473_s6 = scalar_lea.hbm %s678_s3, 256 }
  0x99   : > { %p470_p6 = scmp.ne.s32.totalorder %s628_s23, %s469_s30  ;;  %p474_p10 = scmp.lt.u32.totalorder %s628_s23, %s678_s3 }
  0x9a   : > { %p475_p11 = scmp.lt.u32.totalorder %s473_s6, %s469_s30  ;;  %p477_p13 = scmp.lt.u32.totalorder %s469_s30, %s628_s23 }
  0x9b   : > { %p471_p7 = pnand %p470_p6, %p597_p4 }
  0x9c   : > { %p476_p12 = por %p475_p11, %p474_p10 }
  0x9d   : > { %p472_p9 = pneg %p471_p7 }
  0x9e   : > { %p478_p0 = por %p477_p13, %p476_p12 }
  0xa0   : > { %p479_p1 = pnand %p478_p0, %p472_p9 }
  0xa2   : > { %482 = shalt.err (!%p479_p1)
}
  0xa3   : > { %398 = dma.vmem_to_hbm [thread:$0]  (%p597_p4), %s630_s18, 128, %s628_s23, %s262_s26  }
  0xa4 PF: > { %p404_p2 = scmp.ge.s32.totalorder %s533_s17, 2  ;;  %s289_s9 = sand.u32 1, %s513_s12  }
  0xa5   : > { %s290_s10 = scalar_lea.sflag [#allocation3], %s289_s9 }
  0xa6   : > { %p401_p3 = pnand %p404_p2, %p604_p8 }
  0xa8   : > { %508 = dma.done.wait (!%p401_p3), %s290_s10, 128  }
  0xa9   : > { %510 = vsyncadd (!%p401_p3), %s290_s10, 4294967168  ;;  %s16_s17 = sadd.s32 1, %s533_s17   ;;  %s681_s12 = smov %s517_s13 }
  0xaa   : > { %p13_p5 = scmp.ge.s32.totalorder %s16_s17, 4   ;;  %s682_s13 = smov %s521_s14 }
  0xab   : > { %s683_s14 = smov %s610_s25  ;;  %s684_s15 = smov %s529_s16 }
  0xac   : > { %s685_s16 = smov %s687_s20  ;;  %15 = sbr.rel (!%p13_p5) target bundleno = 4 (0x4), region = 73 }
  0xb3   :  { %295 = vsyncpa [#allocation3], 1 }
  0xb4   :  { %297 = vsyncpa [#allocation3 + $0x1], 1 }

// kernel: cnn_block_forward.2
= control target key start
LH: loop header
LB: loop body
LE: loop exit
PB: predicated region body
PF: predicated region fallthrough
CT: control target
= control target key end

     0   :  { %s1250_s18 = smov 0   ;;  %s1252_s19 = smov 0   ;;  %s1365_s0 = inlined_call_operand.vmem [shape: f32[2,1,16,256], index: 0, kind: input, shape index: {}, may-alias: {0,1}]   ;;  %s1366_s1 = inlined_call_operand.vmem [shape: f32[2,1,16,256], index: 1, kind: input, shape index: {}, may-alias: {0,1}]   ;;  %s1367_s2 = inlined_call_operand.vmem [shape: f32[3,16,8], index: 2, kind: input, shape index: {}]   ;;  %s1368_s3 = inlined_call_operand.vmem [shape: f32[2,8,128], index: 3, kind: output, shape index: {0}]   ;;  %s1369_s4 = inlined_call_operand.vmem [shape: f32[2,8,1], index: 4, kind: output, shape index: {1}]   ;;  %s1370_s5 = inlined_call_operand.vmem [shape: f32[2,8,1], index: 5, kind: output, shape index: {2}]  }
   0x1   :  { %s1254_s20 = smov 0   ;;  %s1256_s21 = smov 0  }
   0x2   :  { %s1258_s22 = smov 0  }
   0x3 LB: > { %s31_s23 = sadd.s32 1, %s1209_s21  ;;  %p51_p1 = scmp.ne.s32.totalorder %s1201_s19, %s1197_s18  ;;  %s1213_s22 = sphi %s1258_s22, %s16_s22   ;;  %s1209_s21 = sphi %s1256_s21, %s1375_s21   ;;  %s1205_s20 = sphi %s1254_s20, %s1374_s20   ;;  %s1201_s19 = sphi %s1252_s19, %s1373_s19   ;;  %s1197_s18 = sphi %s1250_s18, %s1372_s18  }
   0x4   : > { %p33_p0 = scmp.ge.s32.totalorder %s31_s23, 2  ;;  %p52_p2 = scmp.eq.s32.totalorder %s1213_s22, 0 }
   0x5   : > { %s44_s26 = sadd.s32 1, %s1201_s19  ;;  %p1042_p5 = scmp.ge.s32.totalorder %s1213_s22, 2 }
   0x6   : > { %s1377_s23 = smov (%p33_p0, %s31_s23), 0  ;;  %p1281_p3 = por %p52_p2, %p51_p1 }
   0x7   : > { %s39_s25 = ssub.s32 %s1209_s21, %s1377_s23  ;;  %226 = sbr.rel (%p1042_p5) target bundleno = 28 (0x1c), region = 20 }
   0x8   : > { %p42_p4 = scmp.eq.s32.totalorder %s39_s25, 0 }
   0xa   : > { %s1289_s27 = scalar_select %p42_p4, %s1201_s19, %s44_s26  }
   0xe   : > { %229 = sbr.rel (!%p1281_p3) target bundleno = 21 (0x15), region = 24  ;;  %s231_s28 = sand.u32 (%p1281_p3), 1, %s1201_s19  }
   0xf   : > { %s1066_s29 = sshll.u32 (%p1281_p3), %s1209_s21, 5  ;;  %s1043_s30 = sshll.u32 (%p1281_p3), %s231_s28, 4 }
  0x10   : > { %s237_s8 = scalar_lea.vmem (%p1281_p3), %s1365_s0, %s1066_s29  ;;  %s233_s9 = scalar_lea.vmem (%p1281_p3), [#allocation2], %s1043_s30 }
  0x11   : > { %v267_v0 = vld [vmem:[%s237_s8] sm:$0xff] (%p1281_p3)  ;;  %v269_v1 = vld [vmem:[%s237_s8 + $0x10] sm:$0xff] (%p1281_p3) }
  0x12   : > { %268 = vst [vmem:[%s233_s9] sm:$0xff] (%p1281_p3), %v267_v0  ;;  %270 = vst [vmem:[%s233_s9 + $0x8] sm:$0xff] (%p1281_p3), %v269_v1 }
  0x15 PF: > { %276 = sbr.rel (!%p1281_p3) target bundleno = 28 (0x1c), region = 62  ;;  %s278_s10 = sand.u32 (%p1281_p3), 1, %s1201_s19  }
  0x16   : > { %s1067_s11 = sshll.u32 (%p1281_p3), %s1209_s21, 5  ;;  %s1046_s12 = sshll.u32 (%p1281_p3), %s278_s10, 4 }
  0x17   : > { %s911_s15 = scalar_lea.vmem (%p1281_p3), %s1366_s1, %s1067_s11  ;;  %s280_s16 = scalar_lea.vmem (%p1281_p3), [#allocation3], %s1046_s12 }
  0x18   : > { %v1049_v2 = vld [vmem:[%s911_s15 + $0x8] sm:$0xff] (%p1281_p3)  ;;  %v1050_v3 = vld [vmem:[%s911_s15 + $0x18] sm:$0xff] (%p1281_p3) }
  0x19   : > { %316 = vst [vmem:[%s280_s16] sm:$0xff] (%p1281_p3), %v1049_v2  ;;  %318 = vst [vmem:[%s280_s16 + $0x8] sm:$0xff] (%p1281_p3), %v1050_v3 }
  0x1c PF: > { %p1051_p6 = scmp.ge.s32.totalorder %s1213_s22, 1  ;;  %p323_p7 = scmp.lt.s32.totalorder %s1213_s22, 3 }
  0x1e   : > { %p324_p8 = pnand %p1051_p6, %p323_p7 }
  0x1f   : > { %s330_s17 = sand.u32 (!%p324_p8), 1, %s1197_s18   ;;  %v1215_v4 = vmov (!%p324_p8), 0.0|0.0   ;;  %vm1216_vm0 = vmmov (!%p324_p8), 0   ;;  %v1217_v8 = vmov (!%p324_p8), 0.0   ;;  %s1218_s18 = smov (!%p324_p8), 126   ;;  %v431_v13 = vld [vmem:[%s1367_s2] sm:$0xff] (!%p324_p8)  ;;  %v808_v40 = vlaneseq (!%p324_p8) }
  0x20   : > { %327 = sbr.rel (%p324_p8) target bundleno = 578 (0x242), region = 100  ;;  %s1052_s24 = sshll.u32 (!%p324_p8), %s330_s17, 4  ;;  %1098 = vmatprep.subr.bf16.mxu1 (!%p324_p8), %v1215_v4  ;;  %1101 = vmatprep.subr.bf16.mxu0 (!%p324_p8), %v1215_v4  ;;  %v432_v14 = vld [vmem:[%s1367_s2 + $0x8] sm:$0xff] (!%p324_p8)  ;;  %v1061_v15 = vld [vmem:[%s1367_s2 + $0x20] sm:$0xff] (!%p324_p8)  ;;  %v1057_v16 = vld [vmem:[%s1367_s2 + $0x10] sm:$0xff] (!%p324_p8)  ;;  %vm480_vm1 = vcmask (!%p324_p8), 1039360  }
  0x21   : > { %s332_s25 = scalar_lea.vmem (!%p324_p8), [#allocation2], %s1052_s24  ;;  %s339_s26 = scalar_lea.vmem (!%p324_p8), [#allocation3], %s1052_s24  ;;  %1088 = vmatprep.mubr.msk.f32.mxu0 (!%p324_p8), %vm1216_vm0, %v1217_v8  ;;  %1081 = vmatprep.mubr.msk.f32.mxu1 (!%p324_p8), %vm1216_vm0, %v1217_v8  ;;  %v1062_v17 = vld [vmem:[%s1367_s2 + $0x28] sm:$0xff] (!%p324_p8)  ;;  %v1058_v18 = vld [vmem:[%s1367_s2 + $0x18] sm:$0xff] (!%p324_p8)  ;;  %vm707_vm2 = vcmask (!%p324_p8), 1031168   ;;  %vm485_vm3 = vcmask (!%p324_p8), 130048  }
  0x22   : > { %v427_v5 = vld [vmem:[%s332_s25] sm:$0xff] (!%p324_p8)  ;;  %v428_v6 = vld [vmem:[%s332_s25 + $0x8] sm:$0xff] (!%p324_p8)  ;;  %s1219_s28 = smov (!%p324_p8), 127   ;;  %p396_p9 = scmp.lt.s32.totalorder (!%p324_p8), %s1205_s20, 1  ;;  %vm424_vm4 = vcmask (!%p324_p8), 7168   ;;  %v809_v44 = vand.u32 (!%p324_p8), 127, %v808_v40 }
  0x23   : > { %v429_v7 = vld [vmem:[%s339_s26] sm:$0xff] (!%p324_p8)  ;;  %v430_v9 = vld [vmem:[%s339_s26 + $0x8] sm:$0xff] (!%p324_p8)  ;;  %v1102_v11 = vpack.c.bf16 (!%p324_p8), %v428_v6, %v427_v5 }
  0x24   : > { %v1165_v10 = vpack.i.bf16 (!%p324_p8), %v429_v7, %v427_v5  ;;  %v1170_v12 = vpack.i.bf16 (!%p324_p8), %v430_v9, %v428_v6  ;;  %vm813_vm5 = vcmp.lt.s32.totalorder (!%p324_p8), %v809_v44, 16 }
  0x25   : > { %1103 = vmatpush3.bf16.msra.mxu0 (!%p324_p8), %v1102_v11 }
  0x26   : > { %1166 = vrot.lane.b32.xlu1 (!%p324_p8), %v1165_v10, %s1218_s18  ;;  %1156 = vrot.lane.b32.xlu0 (!%p324_p8), %v1165_v10, %s1219_s28 }
  0x27   : > { %1104 = vmatprep.subr.bf16.mxu0 %v1215_v4  ;;  %s1379_s20 = smov (!%p396_p9, %s1205_s20), 1 }
  0x28   : > { %s1054_s16 = sshll.u32 %s1379_s20, 3 }
  0x29   : > { %s412_s25 = scalar_lea.vmem %s1369_s4, %s1054_s16  ;;  %s405_s20 = scalar_lea.vmem %s1368_s3, %s1054_s16 }
  0x2a   : > { %1171 = vrot.lane.b32.xlu1 %v1170_v12, %s1218_s18  ;;  %1161 = vrot.lane.b32.xlu0 %v1170_v12, %s1219_s28  ;;  %425 = vst.msk [vmem:[%s412_s25] sm:$0xff] %vm424_vm4, %v1217_v8  ;;  %s419_s30 = scalar_lea.vmem %s1370_s5, %s1054_s16 }
  0x2b   : > { %426 = vst.msk [vmem:[%s419_s30] sm:$0xff] %vm424_vm4, %v1217_v8 }
  0x31   : > { %v815_v51 = vld [vmem:[%s412_s25] sm:$0xff] }
  0x32   : > { %v821_v53 = vld [vmem:[%s419_s30] sm:$0xff] }
  0x48   : > { %559 = vxpose.xlu0.b32.start [1/2] (short) (narrow) %v431_v13, 8 }
  0x4c   : > { %560 = vxpose.xlu0.b32.end [2/2] (short) (narrow) %v432_v14, 8 }
  0x50   : > { %667 = vxpose.xlu0.b32.start [1/2] (short) (narrow) %v1061_v15, 8 }
  0x53   : > { %436 = vxpose.xlu1.b32.start [1/2] (short) (narrow) %v1057_v16, 8 }
  0x54   : > { %668 = vxpose.xlu0.b32.end [2/2] (short) (narrow) %v1062_v17, 8 }
  0x57   : > { %437 = vxpose.xlu1.b32.end [2/2] (short) (narrow) %v1058_v18, 8 }
  0x98   : > { %v1157_v19 = vpop.permute.xlu0 %1156  ;;  %v1167_v28 = vpop.permute.xlu1 %1166 }
  0x99   : > { %v1159_v20 = vunpack.i.h.bf16 %v1157_v19  ;;  %v1158_v21 = vunpack.i.l.bf16 %v1157_v19  ;;  %v1169_v32 = vunpack.i.h.bf16 %v1167_v28  ;;  %v1168_v33 = vunpack.i.l.bf16 %v1167_v28 }
  0x9b   : > { %v481_v25 = vsel %vm480_vm1, %v1158_v21, %v1159_v20  ;;  %v708_v35 = vsel %vm707_vm2, %v1168_v33, %v1169_v32 }
  0x9c   : > { %v1162_v22 = vpop.permute.xlu0 %1161  ;;  %v1172_v29 = vpop.permute.xlu1 %1171 }
  0x9d   : > { %v1164_v23 = vunpack.i.h.bf16 %v1162_v22  ;;  %v1163_v24 = vunpack.i.l.bf16 %v1162_v22  ;;  %v1174_v30 = vunpack.i.h.bf16 %v1172_v29  ;;  %v1173_v31 = vunpack.i.l.bf16 %v1172_v29 }
  0x9f   : > { %v482_v26 = vsel %vm480_vm1, %v1163_v24, %v1164_v23  ;;  %v709_v34 = vsel %vm707_vm2, %v1173_v31, %v1174_v30 }
  0xa0   : > { %v1099_v27 = vpack.c.bf16 %v482_v26, %v481_v25  ;;  %v1105_v36 = vpack.c.bf16 %v709_v34, %v708_v35 }
  0xa2   : > { %1100 = vmatpush3.bf16.msra.mxu1 %v1099_v27 }
  0xc8   : > { %v575_v37 = vpop.trf.xlu0 }
  0xc9   : > { %1089 = vmatmul.mubr.msk.f32.vlgmr.msra.gmra.mrb[0].mxu0 %vm485_vm3, %v575_v37 }
  0xca   : > { %1106 = vmatpush3.bf16.msra.mxu0 %v1105_v36  ;;  %1095 = vmatprep.mubr.msk.f32.mxu0 %vm1216_vm0, %v1217_v8 }
  0xd0   : > { %v683_v38 = vpop.trf.xlu0 }
  0xd1   : > { %1096 = vmatmul.mubr.msk.f32.vlgmr.msra.gmra.mrb[0].mxu0 %vm485_vm3, %v683_v38 }
  0xd3   : > { %v452_v39 = vpop.trf.xlu1 }
  0xd4   : > { %1082 = vmatmul.mubr.msk.f32.vlgmr.msra.gmra.mrb[0].mxu1 %vm485_vm3, %v452_v39 }
 0x1a4   : > { %v781_v41 = vpop.f32.mrb[0].mxu0 }
 0x1a5   : > { %v1097_v42 = vpop.f32.mrb[1].mxu0 }
 0x1a7   : > { %v555_v43 = vpop.f32.mrb[0].mxu1 }
 0x1a8   : > { %v1107_v45 = vadd.f32 %v781_v41, %v555_v43  ;;  %v1083_v46 = vpop.f32.mrb[1].mxu1 }
 0x1aa   : > { %v786_v47 = vmul.f32 0.01, %v1107_v45 }
 0x1ac   : > { %v787_v48 = vmax.f32 %v1107_v45, %v786_v47 }
 0x1ae   : > { %v814_v49 = vsel %vm813_vm5, %v787_v48, 0.0  ;;  %788 = vst [vmem:[%s405_s20] sm:$0xff] %v787_v48 }
 0x1af   : > { %816 = vadd.xlane.f32.xlu0 %v814_v49  ;;  %v822_v50 = vmul.f32 %v814_v49, %v814_v49 }
 0x1b1   : > { %823 = vadd.xlane.f32.xlu1 %v822_v50 }
 0x23c   : > { %v817_v52 = vpop.xlane.xlu0 %816 }
 0x23d   : > { %v818_v54 = vadd.f32 %v817_v52, %v815_v51 }
 0x23e   : > { %v824_v55 = vpop.xlane.xlu1 %823 }
 0x23f   : > { %820 = vst.msk [vmem:[%s412_s25] sm:$0xff] %vm424_vm4, %v818_v54  ;;  %v825_v56 = vadd.f32 %v824_v55, %v821_v53 }
 0x241   : > { %826 = vst.msk [vmem:[%s419_s30] sm:$0xff] %vm424_vm4, %v825_v56 }
 0x242 PF: > { %s16_s22 = sadd.s32 1, %s1213_s22   ;;  %s1372_s18 = smov %s1201_s19 }
 0x243   : > { %p13_p10 = scmp.ge.s32.totalorder %s16_s22, 4   ;;  %s1373_s19 = smov %s1289_s27 }
 0x244   : > { %s1374_s20 = smov %s1209_s21  ;;  %s1375_s21 = smov %s1377_s23 }
 0x245   :  { %15 = sbr.rel (!%p13_p10) target bundleno = 3 (0x3), region = 192 }

</bundles_post_ra>
